<compile_context>
chip_gen: v5e
topology: v5e:2x2
jax: 0.10.0
libtpu: 0.0.40
codegen_flags: <defaults>
</compile_context>

<pallas_src>
import functools

import jax
import jax.numpy as jnp
from jax.experimental import pallas as pl
from jax.experimental.pallas import tpu as pltpu

_LANE = 512  # lane-dense last dim (multiple of 128)


def _residual_kernel(x_ref, o_ref):
    """out = x + x   (eval mode / p == 0)."""
    x = x_ref[...]
    o_ref[...] = x + x


def _residual_dropout_kernel(x_ref, keep_ref, o_ref, *, scale):
    """out = x + dropout(x) = x * (1 + scale * keep)."""
    x = x_ref[...]
    keep = keep_ref[...].astype(x.dtype)
    one = jnp.asarray(1.0, dtype=x.dtype)
    s = jnp.asarray(scale, dtype=x.dtype)
    o_ref[...] = x * (one + s * keep)


def sublayer_connection(x, *, dropout_p=0.1, key=None, training=True):
    """x: any shape/float dtype. Returns x + dropout(Identity(Identity(x)))."""
    orig_shape = x.shape
    n = int(x.size)

    # Lane-dense layout: (rows_pad, 512), rows tiled in multiples of 8.
    rows = -(-n // _LANE)
    tm = min(512, -(-rows // 8) * 8)        # block rows: multiple of 8, <= 512
    rows_pad = -(-rows // tm) * tm
    total_pad = rows_pad * _LANE

    x_flat = x.reshape(-1)
    if total_pad != n:
        x_flat = jnp.pad(x_flat, (0, total_pad - n))
    x2d = x_flat.reshape(rows_pad, _LANE)

    grid = (rows_pad // tm,)
    blk = (tm, _LANE)
    cparams = pltpu.CompilerParams(dimension_semantics=("parallel",))

    p = float(dropout_p)
    if (not training) or p == 0.0:
        out2d = pl.pallas_call(
            _residual_kernel,
            out_shape=jax.ShapeDtypeStruct((rows_pad, _LANE), x.dtype),
            grid=grid,
            in_specs=[pl.BlockSpec(blk, lambda i: (i, 0))],
            out_specs=pl.BlockSpec(blk, lambda i: (i, 0)),
            compiler_params=cparams,
        )(x2d)
    else:
        if key is None:
            key = jax.random.PRNGKey(0)
        if p >= 1.0:
            # Everything dropped: dropout(x) == 0  ->  out == x.
            keep = jnp.zeros((rows_pad, _LANE), dtype=jnp.uint8)
            scale = 0.0
        else:
            keep = jax.random.bernoulli(
                key, 1.0 - p, (rows_pad, _LANE)).astype(jnp.uint8)
            scale = 1.0 / (1.0 - p)
        kernel = functools.partial(_residual_dropout_kernel, scale=scale)
        out2d = pl.pallas_call(
            kernel,
            out_shape=jax.ShapeDtypeStruct((rows_pad, _LANE), x.dtype),
            grid=grid,
            in_specs=[pl.BlockSpec(blk, lambda i: (i, 0)),
                      pl.BlockSpec(blk, lambda i: (i, 0))],
            out_specs=pl.BlockSpec(blk, lambda i: (i, 0)),
            compiler_params=cparams,
        )(x2d, keep)

    return out2d.reshape(-1)[:n].reshape(orig_shape)


if __name__ == "__main__":
    key = jax.random.PRNGKey(0)
    B, S, D = 2, 8, 32   # (batch, seq, d_model)
    x = jax.random.normal(key, (B, S, D), dtype=jnp.float32)

    # Training mode: dropout active with a deterministic key.
    out_train = sublayer_connection(
        x, dropout_p=0.1, key=jax.random.PRNGKey(42), training=True)
    out_train = jax.block_until_ready(out_train)
    assert out_train.shape == (B, S, D)
    # Each element must be either the dropped branch (x) or the kept branch
    # (x + x / (1 - p)).
    kept_val = x * (1.0 + 1.0 / (1.0 - 0.1))
    ok = (jnp.isclose(out_train, x, atol=1e-5)
          | jnp.isclose(out_train, kept_val, atol=1e-5))
    assert bool(jnp.all(ok)), "train-mode dropout values out of range"

    # Eval mode: dropout is identity -> out == x + x exactly.
    out_eval = sublayer_connection(x, dropout_p=0.1, training=False)
    out_eval = jax.block_until_ready(out_eval)
    assert jnp.allclose(out_eval, x + x, atol=1e-6), "eval-mode residual mismatch"

    # p == 0.0 in training mode is also an identity dropout.
    out_p0 = sublayer_connection(
        x, dropout_p=0.0, key=jax.random.PRNGKey(1), training=True)
    out_p0 = jax.block_until_ready(out_p0)
    assert jnp.allclose(out_p0, x + x, atol=1e-6), "p=0 residual mismatch"

    print("KERNEL_OK")
</pallas_src>

<mosaic_0001>
module attributes {stable_mosaic.version = 11 : i64} {
  func.func @_residual_dropout_kernel(%arg0: i32, %arg1: memref<8x512xf32, #tpu.memory_space<vmem>>, %arg2: memref<8x512xi8, #tpu.memory_space<vmem>>, %arg3: memref<8x512xf32, #tpu.memory_space<vmem>>) attributes {dimension_semantics = [#tpu.dimension_semantics<parallel>], iteration_bounds = array<i64: 1>, scalar_prefetch = 0 : i64, scratch_operands = 0 : i64, tpu.core_type = #tpu.core_type<tc>, window_params = [{transform_indices = @transform_0, window_bounds = array<i64: 8, 512>}, {transform_indices = @transform_1, window_bounds = array<i64: 8, 512>}, {transform_indices = @transform_2, window_bounds = array<i64: 8, 512>}]} {
    %c0 = arith.constant 0 : index
    %c0_0 = arith.constant 0 : index
    %0 = vector.load %arg1[%c0, %c0_0] : memref<8x512xf32, #tpu.memory_space<vmem>>, vector<8x512xf32>
    %c0_1 = arith.constant 0 : index
    %c0_2 = arith.constant 0 : index
    %1 = vector.load %arg2[%c0_1, %c0_2] : memref<8x512xi8, #tpu.memory_space<vmem>>, vector<8x512xi8>
    %2 = arith.uitofp %1 : vector<8x512xi8> to vector<8x512xf32>
    %cst = arith.constant 1.11111116 : f32
    %3 = vector.broadcast %cst : f32 to vector<8x512xf32>
    %4 = arith.mulf %3, %2 : vector<8x512xf32>
    %cst_3 = arith.constant 1.000000e+00 : f32
    %5 = vector.broadcast %cst_3 : f32 to vector<8x512xf32>
    %6 = arith.addf %5, %4 : vector<8x512xf32>
    %7 = arith.mulf %0, %6 : vector<8x512xf32>
    %c0_4 = arith.constant 0 : index
    %c0_5 = arith.constant 0 : index
    %8 = vector.load %arg3[%c0_4, %c0_5] : memref<8x512xf32, #tpu.memory_space<vmem>>, vector<8x512xf32>
    tpu.vector_store %arg3[%c0_4, %c0_5], %7 {strides = array<i32>} : memref<8x512xf32, #tpu.memory_space<vmem>>, vector<8x512xf32>,
    return
  }
  func.func @transform_0(%arg0: i32) -> (i32, i32) {
    %c0_i32 = arith.constant 0 : i32
    %c0_i32_0 = arith.constant 0 : i32
    return %arg0, %c0_i32 : i32, i32
  }
  func.func @transform_1(%arg0: i32) -> (i32, i32) {
    %c0_i32 = arith.constant 0 : i32
    %c0_i32_0 = arith.constant 0 : i32
    return %arg0, %c0_i32 : i32, i32
  }
  func.func @transform_2(%arg0: i32) -> (i32, i32) {
    %c0_i32 = arith.constant 0 : i32
    %c0_i32_0 = arith.constant 0 : i32
    return %arg0, %c0_i32 : i32, i32
  }
}

</mosaic_0001>

<bundles_post_ra>
// kernel: tpu_custom_call.1
= control target key start
LH: loop header
LB: loop body
LE: loop exit
PB: predicated region body
PF: predicated region fallthrough
CT: control target
= control target key end

     0   :  { %7 = vsyncpa [#allocation3], 0  ;;  %s199_s0 = inlined_call_operand.hbm [shape: f32[8,512], index: 0, kind: input, shape index: {}]   ;;  %s200_s1 = inlined_call_operand.hbm [shape: u8[8,512], index: 1, kind: input, shape index: {}]   ;;  %s201_s2 = inlined_call_operand.hbm [shape: f32[8,512], index: 2, kind: output, shape index: {}]  }
   0x1   :  { %8 = vsyncpa [#allocation6], 0 }
   0x2   :  { %9 = vsyncpa [#allocation4], 0  ;;  %s15_s11 = sshll.u32 %s199_s0, 4  ;;  %s172_s12 = smov [#allocation2]   ;;  %s16_s11 = int_to_ptr.hbm [resolvable:$true] %s15_s11 }
   0x3   :  { %s17_s13 = sshll.u32 %s172_s12, 4  ;;  %s26_s16 = sshll.u32 %s200_s1, 4  ;;  %s18_s13 = int_to_ptr.vmem [resolvable:$true] %s17_s13  ;;  %s27_s16 = int_to_ptr.hbm [resolvable:$true] %s26_s16 }
   0x4   :  { %20 = dma.hbm_to_vmem [thread:$0]  %s16_s11, 512, %s18_s13, [#allocation3]  }
   0x5   :  { %s173_s17 = smov [#allocation5]  }
   0x6   :  { %s28_s18 = sshll.u32 %s173_s17, 4  ;;  %s29_s18 = int_to_ptr.vmem [resolvable:$true] %s28_s18 }
   0x7   :  { %31 = dma.hbm_to_vmem [thread:$0]  %s27_s16, 128, %s29_s18, [#allocation6]  }
   0x8   :  { %166 = dma.done.wait [#allocation3], 512  }
   0x9   :  { %167 = vsyncadd [#allocation3], 4294966784 }
   0xa   :  { %168 = dma.done.wait [#allocation6], 128  }
   0xb   :  { %169 = vsyncadd [#allocation6], 4294967168  ;;  %v44_v0 = vld [vmem:[#allocation5] sm:$0xff]  ;;  %v41_v17 = vld [vmem:[#allocation2 + $0x8] sm:$0xff]  ;;  %s174_s0 = smov [#allocation7]   ;;  %s80_s21 = sshll.u32 %s201_s2, 4  ;;  %s81_s21 = int_to_ptr.hbm [resolvable:$true] %s80_s21 }
   0xc   :  { %v45_v1 = vunpack.c.0.s8 %v44_v0  ;;  %v46_v2 = vunpack.c.1.s8 %v44_v0  ;;  %v47_v3 = vunpack.c.2.s8 %v44_v0  ;;  %v48_v4 = vunpack.c.3.s8 %v44_v0  ;;  %v40_v16 = vld [vmem:[#allocation2] sm:$0xff]  ;;  %v42_v18 = vld [vmem:[#allocation2 + $0x10] sm:$0xff]  ;;  %v43_v23 = vld [vmem:[#allocation2 + $0x18] sm:$0xff]  ;;  %s78_s1 = sshll.u32 %s174_s0, 4  ;;  %s79_s1 = int_to_ptr.vmem [resolvable:$true] %s78_s1 }
   0xe   :  { %v49_v5 = vand.u32 255, %v45_v1  ;;  %v50_v6 = vand.u32 255, %v46_v2  ;;  %v51_v7 = vand.u32 255, %v47_v3  ;;  %v52_v8 = vand.u32 255, %v48_v4 }
  0x10   :  { %v53_v9 = vcvt.s32.f32 %v49_v5  ;;  %v54_v10 = vcvt.s32.f32 %v50_v6  ;;  %v55_v11 = vcvt.s32.f32 %v51_v7  ;;  %v56_v12 = vcvt.s32.f32 %v52_v8 }
  0x12   :  { %v57_v13 = vmul.f32 1.1111112, %v53_v9  ;;  %v58_v14 = vmul.f32 1.1111112, %v54_v10  ;;  %v59_v15 = vmul.f32 1.1111112, %v55_v11 }
  0x13   :  { %v60_v19 = vmul.f32 1.1111112, %v56_v12 }
  0x14   :  { %v61_v20 = vadd.f32 1.0, %v57_v13  ;;  %v62_v21 = vadd.f32 1.0, %v58_v14  ;;  %v63_v22 = vadd.f32 1.0, %v59_v15 }
  0x15   :  { %v64_v24 = vadd.f32 1.0, %v60_v19 }
  0x16   :  { %v65_v25 = vmul.f32 %v61_v20, %v40_v16  ;;  %v66_v26 = vmul.f32 %v62_v21, %v41_v17  ;;  %v67_v27 = vmul.f32 %v63_v22, %v42_v18 }
  0x17   :  { %v68_v28 = vmul.f32 %v64_v24, %v43_v23 }
  0x18   :  { %69 = vst [vmem:[#allocation7] sm:$0xff] %v65_v25 }
  0x19   :  { %70 = vst [vmem:[#allocation7 + $0x8] sm:$0xff] %v66_v26 }
  0x1a   :  { %71 = vst [vmem:[#allocation7 + $0x10] sm:$0xff] %v67_v27 }
  0x1b   :  { %72 = vst [vmem:[#allocation7 + $0x18] sm:$0xff] %v68_v28 }
  0x1c   :  { %83 = dma.vmem_to_hbm [thread:$0]  %s79_s1, 512, %s81_s21, [#allocation4]  }
  0x1d   :  { %170 = dma.done.wait [#allocation4], 512  }
  0x1e   :  { %171 = vsyncadd [#allocation4], 4294966784 }
  0x1f   :  { %88 = vsyncpa [#allocation3], 1 }
  0x20   :  { %89 = vsyncpa [#allocation6], 1 }
  0x21   :  { %90 = vsyncpa [#allocation4], 1 }

</bundles_post_ra>
